<compile_context>
chip_gen: v7x
topology: tpu7x:2x2x1
jax: 0.10.0
libtpu: 0.0.40
codegen_flags: <defaults>
</compile_context>

<pallas_src>
import jax
import jax.numpy as jnp
from jax import lax
from jax.experimental import pallas as pl
from jax.experimental.pallas import tpu as pltpu


def _round_up(x, m):
    return (x + m - 1) // m * m


def _pad_to(x, target, axis, value=0.0):
    pad = target - x.shape[axis]
    if pad <= 0:
        return x
    widths = [(0, 0)] * x.ndim
    widths[axis] = (0, pad)
    return jnp.pad(x, widths, constant_values=value)


# ----------------------------- Encoder kernel ------------------------------ #
def encoder_kernel(x_ref, w_e_ref, b_e_ref, w_ctc_ref, b_ctc_ref, w_h_ref,
                   enc_ref, ctc_ref, sh_ref):
    h = jnp.tanh(
        jnp.dot(x_ref[...], w_e_ref[...], preferred_element_type=jnp.float32)
        + b_e_ref[...]
    )
    enc_ref[...] = h

    # CTC head: log-softmax over (padded) classes; pad columns carry -1e9 bias.
    logits = (
        jnp.dot(h, w_ctc_ref[...], preferred_element_type=jnp.float32)
        + b_ctc_ref[...]
    )
    m = jnp.max(logits, axis=-1, keepdims=True)
    z = logits - m
    ctc_ref[...] = z - jnp.log(jnp.sum(jnp.exp(z), axis=-1, keepdims=True))

    # Step-invariant attention projection, hoisted out of the decoder loop.
    sh_ref[...] = jnp.dot(h, w_h_ref[...], preferred_element_type=jnp.float32)


def run_encoder(px, pp):
    B, T, F = px.shape
    H = pp["w_enc"].shape[1]
    Cp = pp["w_ctc_p"].shape[1]
    A = pp["w_h"].shape[1]

    BT = B * T
    row_tile = min(_round_up(BT, 8), 256)
    BT_pad = _round_up(BT, row_tile)

    x = px.reshape(BT, F)
    if BT_pad != BT:
        x = _pad_to(x, BT_pad, 0)

    enc, ctc, sh = pl.pallas_call(
        encoder_kernel,
        out_shape=(
            jax.ShapeDtypeStruct((BT_pad, H), jnp.float32),
            jax.ShapeDtypeStruct((BT_pad, Cp), jnp.float32),
            jax.ShapeDtypeStruct((BT_pad, A), jnp.float32),
        ),
        grid=(BT_pad // row_tile,),
        in_specs=[
            pl.BlockSpec((row_tile, F), lambda i: (i, 0)),
            pl.BlockSpec((F, H), lambda i: (0, 0)),
            pl.BlockSpec((1, H), lambda i: (0, 0)),
            pl.BlockSpec((H, Cp), lambda i: (0, 0)),
            pl.BlockSpec((1, Cp), lambda i: (0, 0)),
            pl.BlockSpec((H, A), lambda i: (0, 0)),
        ],
        out_specs=(
            pl.BlockSpec((row_tile, H), lambda i: (i, 0)),
            pl.BlockSpec((row_tile, Cp), lambda i: (i, 0)),
            pl.BlockSpec((row_tile, A), lambda i: (i, 0)),
        ),
        compiler_params=pltpu.CompilerParams(
            dimension_semantics=("parallel",),
        ),
    )(x, pp["w_enc"], pp["b_enc"], pp["w_ctc_p"], pp["b_ctc_p"], pp["w_h"])

    enc = enc[:BT].reshape(B, T, H)
    ctc = ctc[:BT].reshape(B, T, Cp)
    sh = sh[:BT].reshape(B, T, A)
    return ctc, enc, sh


# ------------------ Attention + LSTM decoder recurrence -------------------- #
def las_decoder_kernel(sh_ref, enc_ref, mask_ref, onehot_ref,
                       w_s_ref, b_a_ref, v_ref, w_loc_ref,
                       w_lstm_ref, b_l_ref, w_o_ref, b_o_ref,
                       hyps_ref, xcat_ref):
    B, T, H = enc_ref.shape
    DH, A = w_s_ref.shape
    Cp = onehot_ref.shape[2]
    num_steps = hyps_ref.shape[0]
    Hp = _round_up(H, 128)

    # Loop-invariant loads, hoisted once.
    sh = sh_ref[...]                       # (B, T, A)  precomputed enc @ W_h
    enc = enc_ref[...]                     # (B, T, H)
    mask = mask_ref[...]                   # (B, T)
    w_s = w_s_ref[...]                     # (DH, A)
    b_a = b_a_ref[...][None, :, :]         # (1, 1, A)
    v = v_ref[...][None, :, :]             # (1, 1, A)
    w_loc = w_loc_ref[0, 0]                # scalar from SMEM
    w_lstm = w_lstm_ref[...]               # (Hp+Cp+DHp, 4*DH)
    b_l = b_l_ref[...]                     # (1, 4*DH)
    w_o = w_o_ref[...]                     # (DH, Cp)
    b_o = b_o_ref[...]                     # (1, Cp)

    # Fused-activation staging buffer: zero once, padded lane ranges stay zero.
    xcat_ref[...] = jnp.zeros_like(xcat_ref)

    neg_big = jnp.float32(-1e9)

    def step(i, carry):
        hid, mem, alpha = carry

        # ---- additive attention with scalar location feedback ----
        ss = jnp.dot(hid, w_s, preferred_element_type=jnp.float32)       # (B, A)
        e = jnp.tanh(sh + ss[:, None, :] + b_a)                          # (B, T, A)
        score = jnp.sum(e * v, axis=-1) + alpha * w_loc                  # (B, T) VPU/XLU
        score = jnp.where(mask > 0.0, score, neg_big)
        score = score - jnp.max(score, axis=-1, keepdims=True)
        ex = jnp.exp(score) * mask
        denom = jnp.maximum(jnp.sum(ex, axis=-1, keepdims=True), 1e-30)
        a = ex / denom                                                   # (B, T)

        # ---- context vector ----
        ctx = jnp.sum(a[:, :, None] * enc, axis=1)                       # (B, H)

        # ---- fused LSTM-cell input matmul: [ctx ; onehot ; hid] @ W ----
        xcat_ref[:, :H] = ctx
        xcat_ref[:, Hp:Hp + Cp] = onehot_ref[i]                          # (B, Cp)
        xcat_ref[:, Hp + Cp:Hp + Cp + DH] = hid
        gates = (
            jnp.dot(xcat_ref[...], w_lstm, preferred_element_type=jnp.float32)
            + b_l
        )                                                                # (B, 4*DH)
        ig = jax.nn.sigmoid(gates[:, 0 * DH:1 * DH])
        fg = jax.nn.sigmoid(gates[:, 1 * DH:2 * DH])
        gg = jnp.tanh(gates[:, 2 * DH:3 * DH])
        og = jax.nn.sigmoid(gates[:, 3 * DH:4 * DH])
        mem_new = fg * mem + ig * gg
        hid_new = og * jnp.tanh(mem_new)

        # ---- output distribution (softmax over real classes; pads ~0) ----
        logits = (
            jnp.dot(hid_new, w_o, preferred_element_type=jnp.float32) + b_o
        )
        mlog = jnp.max(logits, axis=-1, keepdims=True)
        ez = jnp.exp(logits - mlog)
        hyps_ref[i] = ez / jnp.sum(ez, axis=-1, keepdims=True)

        return hid_new, mem_new, a

    hid0 = jnp.zeros((B, DH), jnp.float32)
    mem0 = jnp.zeros((B, DH), jnp.float32)
    alpha0 = jnp.zeros((B, T), jnp.float32)
    lax.fori_loop(0, num_steps, step, (hid0, mem0, alpha0))


def run_decoder(enc_hidden, sh, mask, onehot_lbc, pp, num_steps):
    B, T, H = enc_hidden.shape
    DH = pp["w_s"].shape[0]
    Cp = onehot_lbc.shape[2]
    Hp = _round_up(H, 128)
    DHp = _round_up(DH, 128)
    k_fused = Hp + Cp + DHp

    vmem = pl.BlockSpec(memory_space=pltpu.MemorySpace.VMEM)
    smem = pl.BlockSpec(memory_space=pltpu.MemorySpace.SMEM)

    hyps = pl.pallas_call(
        las_decoder_kernel,
        out_shape=jax.ShapeDtypeStruct((num_steps, B, Cp), jnp.float32),
        in_specs=[
            vmem, vmem, vmem, vmem,          # sh, enc_hidden, mask, onehot (L,B,Cp)
            vmem, vmem, vmem, smem,          # w_s, b_attn, v_row, w_loc (scalar)
            vmem, vmem, vmem, vmem,          # w_lstm(fused), b_lstm, w_out, b_out
        ],
        out_specs=vmem,
        scratch_shapes=[pltpu.VMEM((B, k_fused), jnp.float32)],
    )(
        sh, enc_hidden, mask, onehot_lbc,
        pp["w_s"], pp["b_attn"], pp["v_row"], pp["w_loc"],
        pp["w_lstm"], pp["b_lstm"], pp["w_out_p"], pp["b_out_p"],
    )
    return hyps


# --------------------------- Param preparation ----------------------------- #
def prepare_params(params, C, Cp):
    H = params["w_enc"].shape[1]
    DH = params["w_hh"].shape[0]
    Hp = _round_up(H, 128)
    DHp = _round_up(DH, 128)

    # Fused LSTM input weight, laid out on 128-lane-aligned row blocks so the
    # in-kernel staging stores are vreg-aligned.
    w_xi_p = _pad_to(params["w_xi"], Cp, 0)                  # (Cp, 4*DH)
    w_lstm = jnp.zeros((Hp + Cp + DHp, 4 * DH), jnp.float32)
    w_lstm = w_lstm.at[:H].set(params["w_xc"])
    w_lstm = w_lstm.at[Hp:Hp + Cp].set(w_xi_p)
    w_lstm = w_lstm.at[Hp + Cp:Hp + Cp + DH].set(params["w_hh"])

    return {
        "w_enc": params["w_enc"],
        "b_enc": params["b_enc"],
        "w_ctc_p": _pad_to(params["w_ctc"], Cp, 1),
        "b_ctc_p": _pad_to(params["b_ctc"], Cp, 1, value=-1e9),
        "w_h": params["w_h"],
        "w_s": params["w_s"],
        "b_attn": params["b_attn"],
        "v_row": params["v_attn"].reshape(1, -1),
        "w_loc": params["w_loc"],
        "w_lstm": w_lstm,
        "b_lstm": params["b_lstm"],
        "w_out_p": _pad_to(params["w_out"], Cp, 1),
        "b_out_p": _pad_to(params["b_out"], Cp, 1, value=-1e9),
    }


# ------------------------------ Full forward ------------------------------- #
def model_forward(px, bt, xl, tl, params, hd):
    B, T, F = px.shape
    C = hd["CLASS_SIZE_ATTN"]
    L = bt.shape[1]
    num_steps = L - 1          # max(tl) - 1 (tl padded to L)
    Cp = _round_up(C, 128)

    pp = prepare_params(params, C, Cp)

    onehot_targets = jax.nn.one_hot(bt, C, dtype=jnp.float32)            # (B, L, C)

    ctc_dist_p, enc_hidden, sh = run_encoder(px, pp)
    ctc_dist = ctc_dist_p[..., :C]                                       # (B, T, C)

    # mask[i, t] = 1.0 for t < xl[i], else 0.0
    mask = (jnp.arange(T)[None, :] < xl[:, None]).astype(jnp.float32)

    # Decoder one-hot targets built directly in (L, B, Cp) layout (no float
    # transpose of a lane-sparse (B, L, C) tensor).
    onehot_lbc = jax.nn.one_hot(bt.T, Cp, dtype=jnp.float32)             # (L, B, Cp)

    hyps = run_decoder(enc_hidden, sh, mask, onehot_lbc, pp, num_steps)  # (L-1, B, Cp)
    attn_hyps = jnp.transpose(hyps, (1, 0, 2))[:, :, :C]                 # (B, L-1, C)

    return ctc_dist, attn_hyps, onehot_targets, bt, xl, tl


# ------------------------------ Param setup -------------------------------- #
def init_params(key, F, H, DH, A, C):
    ks = jax.random.split(key, 12)
    s = 0.1
    return {
        "w_enc": s * jax.random.normal(ks[0], (F, H), jnp.float32),
        "b_enc": jnp.zeros((1, H), jnp.float32),
        "w_ctc": s * jax.random.normal(ks[1], (H, C), jnp.float32),
        "b_ctc": jnp.zeros((1, C), jnp.float32),
        "w_h": s * jax.random.normal(ks[2], (H, A), jnp.float32),
        "w_s": s * jax.random.normal(ks[3], (DH, A), jnp.float32),
        "b_attn": jnp.zeros((1, A), jnp.float32),
        "v_attn": s * jax.random.normal(ks[4], (A, 1), jnp.float32),
        "w_loc": s * jnp.ones((1, 1), jnp.float32),
        "w_xc": s * jax.random.normal(ks[5], (H, 4 * DH), jnp.float32),
        "w_xi": s * jax.random.normal(ks[6], (C, 4 * DH), jnp.float32),
        "w_hh": s * jax.random.normal(ks[7], (DH, 4 * DH), jnp.float32),
        "b_lstm": jnp.zeros((1, 4 * DH), jnp.float32),
        "w_out": s * jax.random.normal(ks[8], (DH, C), jnp.float32),
        "b_out": jnp.zeros((1, C), jnp.float32),
    }


if __name__ == "__main__":
    B, T, F = 2, 16, 8       # batch, input frames, feature size
    H = 32                   # encoder hidden size
    DH = 32                  # decoder hidden size
    A = 16                   # attention projection size
    C = 12                   # CLASS_SIZE_ATTN (== CLASS_SIZE here)
    L = 8                    # max target length

    hd = {
        "BATCH_SIZE": B,
        "DEC_HID_SIZE": DH,
        "CLASS_SIZE": C,
        "CLASS_SIZE_ATTN": C,
    }

    key = jax.random.PRNGKey(0)
    k_px, k_bt, k_par = jax.random.split(key, 3)

    px = jax.random.normal(k_px, (B, T, F), jnp.float32)
    bt = jax.random.randint(k_bt, (B, L), 0, C, dtype=jnp.int32)
    xl = jnp.array([T, T - 4], dtype=jnp.int32)
    tl = jnp.array([L, L - 2], dtype=jnp.int32)

    params = init_params(k_par, F, H, DH, A, C)

    ctc_dist, attn_hyps, onehot_targets, bt_o, xl_o, tl_o = model_forward(
        px, bt, xl, tl, params, hd
    )
    jax.block_until_ready((ctc_dist, attn_hyps, onehot_targets))

    assert ctc_dist.shape == (B, T, C)
    assert attn_hyps.shape == (B, L - 1, C)
    assert onehot_targets.shape == (B, L, C)
    # padding sanity: real-class softmax/log-softmax must be properly normalized
    assert bool(jnp.allclose(attn_hyps.sum(-1), 1.0, atol=1e-3))
    assert bool(jnp.allclose(jax.nn.logsumexp(ctc_dist, axis=-1), 0.0, atol=1e-3))
    print("KERNEL_OK")
</pallas_src>

<mosaic_0001>
module attributes {stable_mosaic.version = 11 : i64} {
  func.func @encoder_kernel(%arg0: i32, %arg1: memref<32x8xf32, #tpu.memory_space<vmem>>, %arg2: memref<8x32xf32, #tpu.memory_space<vmem>>, %arg3: memref<1x32xf32, #tpu.memory_space<vmem>>, %arg4: memref<32x128xf32, #tpu.memory_space<vmem>>, %arg5: memref<1x128xf32, #tpu.memory_space<vmem>>, %arg6: memref<32x16xf32, #tpu.memory_space<vmem>>, %arg7: memref<32x32xf32, #tpu.memory_space<vmem>>, %arg8: memref<32x128xf32, #tpu.memory_space<vmem>>, %arg9: memref<32x16xf32, #tpu.memory_space<vmem>>) attributes {dimension_semantics = [#tpu.dimension_semantics<parallel>], iteration_bounds = array<i64: 1>, scalar_prefetch = 0 : i64, scratch_operands = 0 : i64, tpu.core_type = #tpu.core_type<tc>, window_params = [{transform_indices = @transform_0, window_bounds = array<i64: 32, 8>}, {pipeline_mode = #tpu.pipeline_mode<synchronous>, transform_indices = @transform_1, window_bounds = array<i64: 8, 32>}, {pipeline_mode = #tpu.pipeline_mode<synchronous>, transform_indices = @transform_2, window_bounds = array<i64: 1, 32>}, {pipeline_mode = #tpu.pipeline_mode<synchronous>, transform_indices = @transform_3, window_bounds = array<i64: 32, 128>}, {pipeline_mode = #tpu.pipeline_mode<synchronous>, transform_indices = @transform_4, window_bounds = array<i64: 1, 128>}, {pipeline_mode = #tpu.pipeline_mode<synchronous>, transform_indices = @transform_5, window_bounds = array<i64: 32, 16>}, {transform_indices = @transform_6, window_bounds = array<i64: 32, 32>}, {transform_indices = @transform_7, window_bounds = array<i64: 32, 128>}, {transform_indices = @transform_8, window_bounds = array<i64: 32, 16>}]} {
    %c0 = arith.constant 0 : index
    %c0_0 = arith.constant 0 : index
    %0 = vector.load %arg1[%c0, %c0_0] : memref<32x8xf32, #tpu.memory_space<vmem>>, vector<32x8xf32>
    %c0_1 = arith.constant 0 : index
    %c0_2 = arith.constant 0 : index
    %1 = vector.load %arg2[%c0_1, %c0_2] : memref<8x32xf32, #tpu.memory_space<vmem>>, vector<8x32xf32>
    %cst = arith.constant dense<0.000000e+00> : vector<32x32xf32>
    %2 = tpu.matmul %0, %1, %cst {dimension_numbers = #tpu.dot_dimension_numbers<[1], [0], [0], [1], [0, 0, 1, 1], [], []>} : vector<32x8xf32>, vector<8x32xf32>, vector<32x32xf32> -> vector<32x32xf32>
    %c0_3 = arith.constant 0 : index
    %c0_4 = arith.constant 0 : index
    %3 = vector.load %arg3[%c0_3, %c0_4] : memref<1x32xf32, #tpu.memory_space<vmem>>, vector<1x32xf32>
    %4 = vector.broadcast %3 : vector<1x32xf32> to vector<32x32xf32>
    %5 = arith.addf %2, %4 : vector<32x32xf32>
    %6 = math.tanh %5 : vector<32x32xf32>
    %c0_5 = arith.constant 0 : index
    %c0_6 = arith.constant 0 : index
    %7 = vector.load %arg7[%c0_5, %c0_6] : memref<32x32xf32, #tpu.memory_space<vmem>>, vector<32x32xf32>
    tpu.vector_store %arg7[%c0_5, %c0_6], %6 {strides = array<i32>} : memref<32x32xf32, #tpu.memory_space<vmem>>, vector<32x32xf32>,
    %c0_7 = arith.constant 0 : index
    %c0_8 = arith.constant 0 : index
    %8 = vector.load %arg4[%c0_7, %c0_8] : memref<32x128xf32, #tpu.memory_space<vmem>>, vector<32x128xf32>
    %cst_9 = arith.constant dense<0.000000e+00> : vector<32x128xf32>
    %9 = tpu.matmul %6, %8, %cst_9 {dimension_numbers = #tpu.dot_dimension_numbers<[1], [0], [0], [1], [0, 0, 1, 1], [], []>} : vector<32x32xf32>, vector<32x128xf32>, vector<32x128xf32> -> vector<32x128xf32>
    %c0_10 = arith.constant 0 : index
    %c0_11 = arith.constant 0 : index
    %10 = vector.load %arg5[%c0_10, %c0_11] : memref<1x128xf32, #tpu.memory_space<vmem>>, vector<1x128xf32>
    %11 = vector.broadcast %10 : vector<1x128xf32> to vector<32x128xf32>
    %12 = arith.addf %9, %11 : vector<32x128xf32>
    %cst_12 = arith.constant dense<0xFF800000> : vector<32xf32>
    %13 = vector.multi_reduction <maximumf>, %12, %cst_12 [1] : vector<32x128xf32> to vector<32xf32>
    %14 = vector.shape_cast %13 : vector<32xf32> to vector<32x1xf32>
    %15 = vector.broadcast %14 : vector<32x1xf32> to vector<32x128xf32>
    %16 = arith.subf %12, %15 : vector<32x128xf32>
    %17 = math.exp %16 : vector<32x128xf32>
    %cst_13 = arith.constant dense<0.000000e+00> : vector<32xf32>
    %18 = vector.multi_reduction <add>, %17, %cst_13 [1] : vector<32x128xf32> to vector<32xf32>
    %19 = vector.shape_cast %18 : vector<32xf32> to vector<32x1xf32>
    %20 = math.log %19 : vector<32x1xf32>
    %21 = vector.broadcast %20 : vector<32x1xf32> to vector<32x128xf32>
    %22 = arith.subf %16, %21 : vector<32x128xf32>
    %c0_14 = arith.constant 0 : index
    %c0_15 = arith.constant 0 : index
    %23 = vector.load %arg8[%c0_14, %c0_15] : memref<32x128xf32, #tpu.memory_space<vmem>>, vector<32x128xf32>
    tpu.vector_store %arg8[%c0_14, %c0_15], %22 {strides = array<i32>} : memref<32x128xf32, #tpu.memory_space<vmem>>, vector<32x128xf32>,
    %c0_16 = arith.constant 0 : index
    %c0_17 = arith.constant 0 : index
    %24 = vector.load %arg6[%c0_16, %c0_17] : memref<32x16xf32, #tpu.memory_space<vmem>>, vector<32x16xf32>
    %cst_18 = arith.constant dense<0.000000e+00> : vector<32x16xf32>
    %25 = tpu.matmul %6, %24, %cst_18 {dimension_numbers = #tpu.dot_dimension_numbers<[1], [0], [0], [1], [0, 0, 1, 1], [], []>} : vector<32x32xf32>, vector<32x16xf32>, vector<32x16xf32> -> vector<32x16xf32>
    %c0_19 = arith.constant 0 : index
    %c0_20 = arith.constant 0 : index
    %26 = vector.load %arg9[%c0_19, %c0_20] : memref<32x16xf32, #tpu.memory_space<vmem>>, vector<32x16xf32>
    tpu.vector_store %arg9[%c0_19, %c0_20], %25 {strides = array<i32>} : memref<32x16xf32, #tpu.memory_space<vmem>>, vector<32x16xf32>,
    return
  }
  func.func @transform_0(%arg0: i32) -> (i32, i32) {
    %c0_i32 = arith.constant 0 : i32
    %c0_i32_0 = arith.constant 0 : i32
    return %arg0, %c0_i32 : i32, i32
  }
  func.func @transform_1(%arg0: i32) -> (i32, i32) {
    %c0_i32 = arith.constant 0 : i32
    %c0_i32_0 = arith.constant 0 : i32
    %c0_i32_1 = arith.constant 0 : i32
    return %c0_i32, %c0_i32_0 : i32, i32
  }
  func.func @transform_2(%arg0: i32) -> (i32, i32) {
    %c0_i32 = arith.constant 0 : i32
    %c0_i32_0 = arith.constant 0 : i32
    %c0_i32_1 = arith.constant 0 : i32
    return %c0_i32, %c0_i32_0 : i32, i32
  }
  func.func @transform_3(%arg0: i32) -> (i32, i32) {
    %c0_i32 = arith.constant 0 : i32
    %c0_i32_0 = arith.constant 0 : i32
    %c0_i32_1 = arith.constant 0 : i32
    return %c0_i32, %c0_i32_0 : i32, i32
  }
  func.func @transform_4(%arg0: i32) -> (i32, i32) {
    %c0_i32 = arith.constant 0 : i32
    %c0_i32_0 = arith.constant 0 : i32
    %c0_i32_1 = arith.constant 0 : i32
    return %c0_i32, %c0_i32_0 : i32, i32
  }
  func.func @transform_5(%arg0: i32) -> (i32, i32) {
    %c0_i32 = arith.constant 0 : i32
    %c0_i32_0 = arith.constant 0 : i32
    %c0_i32_1 = arith.constant 0 : i32
    return %c0_i32, %c0_i32_0 : i32, i32
  }
  func.func @transform_6(%arg0: i32) -> (i32, i32) {
    %c0_i32 = arith.constant 0 : i32
    %c0_i32_0 = arith.constant 0 : i32
    return %arg0, %c0_i32 : i32, i32
  }
  func.func @transform_7(%arg0: i32) -> (i32, i32) {
    %c0_i32 = arith.constant 0 : i32
    %c0_i32_0 = arith.constant 0 : i32
    return %arg0, %c0_i32 : i32, i32
  }
  func.func @transform_8(%arg0: i32) -> (i32, i32) {
    %c0_i32 = arith.constant 0 : i32
    %c0_i32_0 = arith.constant 0 : i32
    return %arg0, %c0_i32 : i32, i32
  }
}

</mosaic_0001>

<bundles_post_ra>
// kernel: tpu_custom_call.1
= control target key start
LH: loop header
LB: loop body
LE: loop exit
PB: predicated region body
PF: predicated region fallthrough
CT: control target
= control target key end

     0   :  { %14 = vsyncpa [#allocation3], 0  ;;  %vm40_vm0 = vcmask 64512   ;;  %s744_s0 = inlined_call_operand.vmem [shape: f32[32,8], index: 0, kind: input, shape index: {}]   ;;  %s745_s1 = inlined_call_operand.vmem [shape: f32[8,32], index: 1, kind: input, shape index: {}]   ;;  %s746_s2 = inlined_call_operand.vmem [shape: f32[1,32], index: 2, kind: input, shape index: {}]   ;;  %s747_s3 = inlined_call_operand.vmem [shape: f32[32,128], index: 3, kind: input, shape index: {}]   ;;  %s748_s4 = inlined_call_operand.vmem [shape: f32[1,128], index: 4, kind: input, shape index: {}]   ;;  %s749_s5 = inlined_call_operand.vmem [shape: f32[32,16], index: 5, kind: input, shape index: {}]   ;;  %s750_s6 = inlined_call_operand.hbm [shape: f32[32,32], index: 6, kind: output, shape index: {0}]   ;;  %s751_s7 = inlined_call_operand.hbm [shape: f32[32,128], index: 7, kind: output, shape index: {1}]   ;;  %s752_s8 = inlined_call_operand.vmem [shape: f32[32,16], index: 8, kind: output, shape index: {2}]  }
   0x1   :  { %v32_v0 = vld [vmem:[%s745_s1] sm:$0xff]  ;;  %v29_v2 = vld [vmem:[%s744_s0 + $0x8] sm:$0xff]  ;;  %v30_v3 = vld [vmem:[%s744_s0 + $0x10] sm:$0xff] }
   0x2   :  { %v28_v1 = vld [vmem:[%s744_s0] sm:$0xff]  ;;  %464 = vmatprep.subr.mxu0 %v32_v0 }
   0x3   :  { %466 = vmatprep.mubr.msk.f32.mxu0 %vm40_vm0, %v28_v1 }
   0x4   :  { %15 = vsyncpa [#allocation5], 0  ;;  %465 = vmatpush3.msra.mxu0 %v32_v0  ;;  %v31_v4 = vld [vmem:[%s744_s0 + $0x18] sm:$0xff]  ;;  %v147_v5 = vld [vmem:[%s747_s3] sm:$0xff]  ;;  %vm142_vm1 = vcmask 261120   ;;  %vm388_vm2 = vcmask 130048  }
   0x5   :  { %467 = vmatmul.mubr.msk.f32.vlgmr.msra.gmra.mrb[0].mxu0 %vm40_vm0, %v29_v2  ;;  %v148_v6 = vld [vmem:[%s747_s3 + $0x8] sm:$0xff]  ;;  %v299_v7 = vld [vmem:[%s749_s5] sm:$0xff]  ;;  %v149_v11 = vld [vmem:[%s747_s3 + $0x10] sm:$0xff] }
   0x6   :  { %469 = vmatprep.mubr.msk.f32.mxu0 %vm40_vm0, %v30_v3  ;;  %v500_v8 = vpack.c.bf16 %v148_v6, %v147_v5  ;;  %v300_v9 = vld [vmem:[%s749_s5 + $0x8] sm:$0xff]  ;;  %v150_v12 = vld [vmem:[%s747_s3 + $0x18] sm:$0xff]  ;;  %v301_v13 = vld [vmem:[%s749_s5 + $0x10] sm:$0xff] }
   0x7   :  { %v508_v10 = vpack.c.bf16 %v300_v9, %v299_v7  ;;  %v504_v14 = vpack.c.bf16 %v150_v12, %v149_v11  ;;  %v302_v15 = vld [vmem:[%s749_s5 + $0x18] sm:$0xff]  ;;  %v429_v17 = vld [vmem:[%s746_s2] ss:$0 sm:$0xff] }
   0x8   :  { %501 = vmatprep.subr.bf16.mxu1 %v500_v8  ;;  %v512_v16 = vpack.c.bf16 %v302_v15, %v301_v13  ;;  %v434_v30 = vld [vmem:[%s748_s4] ss:$0 sm:$0xff] }
   0x9   :  { %470 = vmatmul.mubr.msk.f32.gmra.mrb[2].mxu0 %vm40_vm0, %v31_v4  ;;  %509 = vmatprep.subr.bf16.mxu0 %v508_v10 }
   0xa   :  { %503 = vmatpush3.bf16.msra.mxu1 %v500_v8  ;;  %511 = vmatpush3.bf16.msra.mxu0 %v508_v10 }
   0xb   :  { %505 = vmatprep.subr.bf16.mxu1 %v504_v14  ;;  %513 = vmatprep.subr.bf16.mxu0 %v512_v16 }
   0xe   :  { %507 = vmatpush3.bf16.msra.mxu1 %v504_v14  ;;  %515 = vmatpush3.bf16.msra.mxu0 %v512_v16 }
  0xd8   :  { %v468_v18 = vpop.f32.mrb[0].mxu0 }
  0xd9   :  { %v125_v19 = vadd.f32 %v468_v18, %v429_v17  ;;  %v119_v20 = vpop.f32.mrb[1].mxu0 }
  0xda   :  { %v120_v21 = vadd.f32 %v429_v17, %v119_v20 }
  0xdb   :  { %520 = vtanh.f32 %v125_v19 }
  0xdc   :  { %522 = vtanh.f32 %v120_v21  ;;  %v471_v22 = vpop.f32.mrb[2].mxu0 }
  0xdd   :  { %v135_v23 = vadd.f32 %v471_v22, %v429_v17  ;;  %v129_v24 = vpop.f32.mrb[3].mxu0 }
  0xde   :  { %v130_v25 = vadd.f32 %v429_v17, %v129_v24 }
  0xdf   :  { %524 = vtanh.f32 %v135_v23 }
  0xe0   :  { %526 = vtanh.f32 %v130_v25 }
  0xe5   :  { %v521_v26 = vpop.eup %520 }
  0xe6   :  { %v523_v27 = vpop.eup %522  ;;  %144 = vst.msk [vmem:[#allocation2 + $0x8] sm:$0xff] %vm142_vm1, %v521_v26 }
  0xe7   :  { %480 = vmatprep.mubr.msk.f32.mxu1 %vm142_vm1, %v523_v27  ;;  %143 = vst.msk [vmem:[#allocation2] sm:$0xff] %vm142_vm1, %v523_v27  ;;  %494 = vmatprep.mubr.msk.f32.mxu0 %vm142_vm1, %v523_v27 }
  0xe8   :  { %481 = vmatmul.mubr.msk.f32.vlgmr.msra.gmra.mrb[0].mxu1 %vm142_vm1, %v521_v26  ;;  %495 = vmatmul.mubr.msk.f32.vlgmr.msra.gmra.mrb[4].mxu0 %vm142_vm1, %v521_v26 }
  0xe9   :  { %v525_v28 = vpop.eup %524 }
  0xea   :  { %v527_v29 = vpop.eup %526  ;;  %146 = vst.msk [vmem:[#allocation2 + $0x18] sm:$0xff] %vm142_vm1, %v525_v28 }
  0xeb   :  { %145 = vst.msk [vmem:[#allocation2 + $0x10] sm:$0xff] %vm142_vm1, %v527_v29  ;;  %483 = vmatprep.mubr.msk.f32.mxu1 %vm142_vm1, %v527_v29  ;;  %497 = vmatprep.mubr.msk.f32.mxu0 %vm142_vm1, %v527_v29 }
  0xec   :  { %484 = vmatmul.mubr.msk.f32.gmra.mrb[2].mxu1 %vm142_vm1, %v525_v28  ;;  %498 = vmatmul.mubr.msk.f32.gmra.mrb[6].mxu0 %vm142_vm1, %v525_v28 }
 0x1bb   :  { %v482_v31 = vpop.f32.mrb[0].mxu1  ;;  %v496_v32 = vpop.f32.mrb[4].mxu0 }
 0x1bc   :  { %390 = vst.msk [vmem:[%s752_s8 + $0x8] sm:$0xff] %vm388_vm2, %v496_v32  ;;  %v236_v33 = vpop.f32.mrb[1].mxu1  ;;  %v369_v34 = vpop.f32.mrb[5].mxu0  ;;  %v242_v40 = vadd.f32 %v482_v31, %v434_v30 }
 0x1bd   :  { %v237_v35 = vadd.f32 %v434_v30, %v236_v33  ;;  %389 = vst.msk [vmem:[%s752_s8] sm:$0xff] %vm388_vm2, %v369_v34 }
 0x1bf   :  { %v485_v36 = vpop.f32.mrb[2].mxu1  ;;  %v499_v37 = vpop.f32.mrb[6].mxu0  ;;  %255 = vmax.xlane.f32.xlu0 %v237_v35 }
 0x1c0   :  { %392 = vst.msk [vmem:[%s752_s8 + $0x18] sm:$0xff] %vm388_vm2, %v499_v37  ;;  %v246_v38 = vpop.f32.mrb[3].mxu1  ;;  %v379_v39 = vpop.f32.mrb[7].mxu0  ;;  %v252_v42 = vadd.f32 %v485_v36, %v434_v30 }
 0x1c1   :  { %v247_v41 = vadd.f32 %v434_v30, %v246_v38  ;;  %391 = vst.msk [vmem:[%s752_s8 + $0x10] sm:$0xff] %vm388_vm2, %v379_v39  ;;  %s592_s8 = smov [#allocation2]  }
 0x1c2   :  { %s398_s14 = sshll.u32 %s592_s8, 4  ;;  %s399_s14 = int_to_ptr.vmem [resolvable:$true] %s398_s14 }
 0x1c3   :  { %259 = vmax.xlane.f32.xlu1 %v247_v41  ;;  %257 = vmax.xlane.f32.xlu0 %v242_v40  ;;  %s544_s15 = scalar_lea.vmem %s399_s14, 512  ;;  %p549_p1 = scmp.lt.s32.totalorder %s399_s14, %s399_s14 }
 0x1c4   :  { %p545_p0 = scmp.ne.s32.totalorder %s399_s14, %s544_s15  ;;  %p550_p2 = scmp.lt.s32.totalorder %s544_s15, %s544_s15 }
 0x1c6   :  { %p551_p3 = por %p550_p2, %p549_p1 }
 0x1c7   :  { %261 = vmax.xlane.f32.xlu1 %v252_v42 }
 0x1c8   :  { %p552_p4 = pnand %p551_p3, %p545_p0 }
 0x24c   :  { %v256_v43 = vpop.xlane.xlu0 %255 }
 0x24d   :  { %v263_v44 = vsub.f32 %v237_v35, %v256_v43 }
 0x24f   :  { %v267_v45 = vmul.f32 1.442695, %v263_v44 }
 0x250   :  { %v260_v46 = vpop.xlane.xlu1 %259  ;;  %v258_v47 = vpop.xlane.xlu0 %257 }
 0x251   :  { %528 = vpow2.f32 %v267_v45  ;;  %v265_v48 = vsub.f32 %v247_v41, %v260_v46  ;;  %v264_v49 = vsub.f32 %v242_v40, %v258_v47 }
 0x253   :  { %v271_v50 = vmul.f32 1.442695, %v265_v48  ;;  %v269_v51 = vmul.f32 1.442695, %v264_v49 }
 0x254   :  { %v262_v52 = vpop.xlane.xlu1 %261 }
 0x255   :  { %530 = vpow2.f32 %v271_v50  ;;  %v266_v53 = vsub.f32 %v252_v42, %v262_v52 }
 0x256   :  { %532 = vpow2.f32 %v269_v51 }
 0x257   :  { %v273_v54 = vmul.f32 1.442695, %v266_v53 }
 0x259   :  { %534 = vpow2.f32 %v273_v54 }
 0x25b   :  { %v529_v55 = vpop.eup %528 }
 0x25c   :  { %275 = vadd.xlane.f32.xlu0 %v529_v55 }
 0x25f   :  { %v531_v56 = vpop.eup %530 }
 0x260   :  { %v533_v57 = vpop.eup %532  ;;  %279 = vadd.xlane.f32.xlu0 %v531_v56 }
 0x261   :  { %277 = vadd.xlane.f32.xlu1 %v533_v57 }
 0x263   :  { %v535_v58 = vpop.eup %534 }
 0x265   :  { %281 = vadd.xlane.f32.xlu1 %v535_v58 }
 0x266   :  { %555 = shalt.err (!%p552_p4)
}
 0x267   :  { %s556_s18 = scalar_lea.hbm %s750_s6, 512 }
 0x268   :  { %p557_p5 = scmp.ne.s32.totalorder %s750_s6, %s556_s18  ;;  %p560_p6 = scmp.lt.u32.totalorder %s556_s18, %s750_s6 }
 0x26a   :  { %p562_p7 = pnand %p560_p6, %p557_p5 }
 0x26c   :  { %565 = shalt.err (!%p562_p7)
}
 0x26d   :  { %s593_s22 = smov 128   ;;  %s594_s23 = smov 8  }
 0x26e   :  { %404 = dma.vmem_to_hbm [thread:$0]  %s399_s14, 512, %s750_s6, [#allocation3], %s593_s22, %s593_s22, %s594_s23  }
 0x26f   :  { %s595_s6 = smov [#allocation4]  }
 0x270   :  { %s410_s26 = sshll.u32 %s595_s6, 4  ;;  %s411_s26 = int_to_ptr.vmem [resolvable:$true] %s410_s26 }
 0x271   :  { %s566_s27 = scalar_lea.vmem %s411_s26, 512  ;;  %p571_p9 = scmp.lt.s32.totalorder %s411_s26, %s411_s26 }
 0x272   :  { %p567_p8 = scmp.ne.s32.totalorder %s411_s26, %s566_s27  ;;  %p572_p10 = scmp.lt.s32.totalorder %s566_s27, %s566_s27 }
 0x274   :  { %p573_p11 = por %p572_p10, %p571_p9 }
 0x276   :  { %p574_p12 = pnand %p573_p11, %p567_p8 }
 0x2e9   :  { %v276_v59 = vpop.xlane.xlu0 %275 }
 0x2ea   :  { %536 = vlog2.f32 %v276_v59 }
 0x2ed   :  { %v280_v60 = vpop.xlane.xlu0 %279 }
 0x2ee   :  { %v278_v61 = vpop.xlane.xlu1 %277  ;;  %538 = vlog2.f32 %v280_v60 }
 0x2ef   :  { %540 = vlog2.f32 %v278_v61 }
 0x2f2   :  { %v282_v62 = vpop.xlane.xlu1 %281 }
 0x2f3   :  { %542 = vlog2.f32 %v282_v62 }
 0x2f4   :  { %v537_v63 = vpop.eup %536 }
 0x2f5   :  { %v284_v0 = vmul.f32 0.6931472, %v537_v63 }
 0x2f7   :  { %v291_v1 = vsub.f32 %v263_v44, %v284_v0 }
 0x2f8   :  { %v539_v2 = vpop.eup %538 }
 0x2f9   :  { %v541_v3 = vpop.eup %540  ;;  %295 = vst [vmem:[#allocation4] sm:$0xff] %v291_v1  ;;  %v288_v4 = vmul.f32 0.6931472, %v539_v2 }
 0x2fa   :  { %v286_v5 = vmul.f32 0.6931472, %v541_v3 }
 0x2fb   :  { %v293_v6 = vsub.f32 %v265_v48, %v288_v4 }
 0x2fc   :  { %v292_v7 = vsub.f32 %v264_v49, %v286_v5 }
 0x2fd   :  { %v543_v8 = vpop.eup %542  ;;  %297 = vst [vmem:[#allocation4 + $0x10] sm:$0xff] %v293_v6 }
 0x2fe   :  { %296 = vst [vmem:[#allocation4 + $0x8] sm:$0xff] %v292_v7  ;;  %v290_v9 = vmul.f32 0.6931472, %v543_v8 }
 0x300   :  { %v294_v10 = vsub.f32 %v266_v53, %v290_v9 }
 0x302   :  { %298 = vst [vmem:[#allocation4 + $0x18] sm:$0xff] %v294_v10 }
 0x303   :  { %577 = shalt.err (!%p574_p12)
}
 0x304   :  { %s578_s30 = scalar_lea.hbm %s751_s7, 512 }
 0x305   :  { %p579_p13 = scmp.ne.s32.totalorder %s751_s7, %s578_s30  ;;  %p582_p0 = scmp.lt.u32.totalorder %s578_s30, %s751_s7 }
 0x307   :  { %p584_p1 = pnand %p582_p0, %p579_p13 }
 0x309   :  { %587 = shalt.err (!%p584_p1)
}
 0x30a   :  { %416 = dma.vmem_to_hbm [thread:$0]  %s411_s26, 512, %s751_s7, [#allocation5], %s593_s22, %s593_s22, %s594_s23  }
 0x30b   :  { %588 = dma.done.wait [#allocation3], 512  }
 0x30c   :  { %589 = vsyncadd [#allocation3], 4294966784 }
 0x30d   :  { %590 = dma.done.wait [#allocation5], 512  }
 0x30e   :  { %591 = vsyncadd [#allocation5], 4294966784 }
 0x30f   :  { %427 = vsyncpa [#allocation3], 1 }
 0x310   :  { %428 = vsyncpa [#allocation5], 1 }

</bundles_post_ra>
